<compile_context>
chip_gen: v6e
topology: v6e:2x2x1
jax: 0.10.0
libtpu: 0.0.40
codegen_flags: <defaults>
</compile_context>

<pallas_src>
import functools
import math

import jax
import jax.numpy as jnp
from jax.experimental import pallas as pl
from jax.experimental.pallas import tpu as pltpu


# ----------------------------------------------------------------------------
# small helpers
# ----------------------------------------------------------------------------
def _cdiv(a, b):
    return -(-a // b)


def _round_up(a, b):
    return _cdiv(a, b) * b


def _silu(x):
    return x * jax.nn.sigmoid(x)


def _lrelu(x, slope=0.1):
    return jnp.where(x > 0, x, slope * x)


_VMEM_LIMIT = 32 * 1024 * 1024  # conservative: fits v5e/v6e/v7x scoped budgets


# ----------------------------------------------------------------------------
# Kernel 1: forward_features hot path
#   features = Linear_text(contents) + spk_embed + pitch_shift_embed
#   features = SiLU(Linear1(features)); features = SiLU(Linear2(features))
#   features *= (1 - src_mask)
# ----------------------------------------------------------------------------
def _features_kernel(contents_ref, spk_ref, ps_ref, keep_ref,
                     wt_ref, bt_ref, w1_ref, b1_ref, w2_ref, b2_ref, o_ref):
    x = contents_ref[0]                                               # (T, Cin) bf16
    f = jnp.dot(x, wt_ref[...], preferred_element_type=jnp.float32) + bt_ref[...]
    f = f + spk_ref[0] + ps_ref[0]                                    # (T,H)+(1,H)+(1,H)
    h = jnp.dot(f.astype(jnp.bfloat16), w1_ref[...],
                preferred_element_type=jnp.float32) + b1_ref[...]
    h = _silu(h)
    h = jnp.dot(h.astype(jnp.bfloat16), w2_ref[...],
                preferred_element_type=jnp.float32) + b2_ref[...]
    h = _silu(h)
    h = h * keep_ref[0]                                               # (T,1) keep mask
    o_ref[0] = h.astype(o_ref.dtype)


def fuse_features(contents, spk_embed, ps_embed, keep_mask, params):
    B, T, Cin = contents.shape
    H = params["w_text"].shape[1]

    def full(shape):
        return pl.BlockSpec(shape, lambda b: (0,) * len(shape))

    grid_spec = pltpu.PrefetchScalarGridSpec(
        num_scalar_prefetch=0,
        grid=(B,),
        in_specs=[
            pl.BlockSpec((1, T, Cin), lambda b: (b, 0, 0)),
            pl.BlockSpec((1, 1, H), lambda b: (b, 0, 0)),
            pl.BlockSpec((1, 1, H), lambda b: (b, 0, 0)),
            pl.BlockSpec((1, T, 1), lambda b: (b, 0, 0)),
            full((Cin, H)), full((1, H)),
            full((H, H)), full((1, H)),
            full((H, H)), full((1, H)),
        ],
        out_specs=pl.BlockSpec((1, T, H), lambda b: (b, 0, 0)),
    )
    return pl.pallas_call(
        _features_kernel,
        out_shape=jax.ShapeDtypeStruct((B, T, H), jnp.bfloat16),
        grid_spec=grid_spec,
        compiler_params=pltpu.CompilerParams(
            dimension_semantics=("parallel",),
            vmem_limit_bytes=_VMEM_LIMIT),
    )(contents, spk_embed, ps_embed, keep_mask,
      params["w_text"], params["b_text"],
      params["w_fuse1"], params["b_fuse1"],
      params["w_fuse2"], params["b_fuse2"])


# ----------------------------------------------------------------------------
# Kernel 2: generic time-tiled "shifted matmul" conv.
#   Covers plain dilated Conv1d (conv_pre, ResBlock convs) and, via a combined
#   per-phase weight, the polyphase form of ConvTranspose1d.  The (K-1)*d halo
#   of each time tile is read through a second small BlockSpec on the padded
#   input, so tiles stay small enough for v7x VMEM and pipeline cleanly.
# ----------------------------------------------------------------------------
def _conv_kernel(xm_ref, xh_ref, w_ref, b_ref, o_ref, *,
                 offsets, tile, pad_l, pre_lrelu, add_residual):
    cin = xm_ref.shape[2]
    # main tile + halo, upcast to f32 for element-wise work (v5e-safe).
    win = jnp.concatenate([xm_ref[0].astype(jnp.float32),
                           xh_ref[0].astype(jnp.float32)], axis=0)    # (tile+hp, Cin)
    res = win[pad_l:pad_l + tile, :] if add_residual else None
    xa = _lrelu(win) if pre_lrelu else win                            # lrelu(0)=0 -> pads stay 0
    if cin % 128 == 0 and len(offsets) > 1:
        # lane-aligned channels: one im2col matmul (full MXU occupancy).
        cols = jnp.concatenate([xa[o:o + tile, :] for o in offsets], axis=1)
        acc = jnp.dot(cols.astype(jnp.bfloat16), w_ref[...],
                      preferred_element_type=jnp.float32)
    else:
        # narrow channels: accumulate per-tap matmuls (no unaligned lane relayouts).
        acc = jnp.dot(xa[offsets[0]:offsets[0] + tile, :].astype(jnp.bfloat16),
                      w_ref[0:cin, :], preferred_element_type=jnp.float32)
        for j, o in enumerate(offsets[1:], start=1):
            acc += jnp.dot(xa[o:o + tile, :].astype(jnp.bfloat16),
                           w_ref[j * cin:(j + 1) * cin, :],
                           preferred_element_type=jnp.float32)
    acc = acc + b_ref[...]
    if add_residual:
        acc = acc + res                                               # fused x + conv(lrelu(x))
    o_ref[0] = acc.astype(o_ref.dtype)


def _call_conv(xp, w, b, *, offsets, tile, nt, pad_l, pre_lrelu, add_residual,
               halo_pad, cout):
    B, _, Cin = xp.shape
    hb = tile // halo_pad
    kern = functools.partial(_conv_kernel, offsets=offsets, tile=tile, pad_l=pad_l,
                             pre_lrelu=pre_lrelu, add_residual=add_residual)
    return pl.pallas_call(
        kern,
        out_shape=jax.ShapeDtypeStruct((B, nt * tile, cout), jnp.bfloat16),
        grid_spec=pltpu.PrefetchScalarGridSpec(
            num_scalar_prefetch=0,
            grid=(B, nt),
            in_specs=[
                pl.BlockSpec((1, tile, Cin), lambda bi, t: (bi, t, 0)),
                pl.BlockSpec((1, halo_pad, Cin), lambda bi, t: (bi, (t + 1) * hb, 0)),
                pl.BlockSpec(w.shape, lambda bi, t: (0,) * w.ndim),
                pl.BlockSpec(b.shape, lambda bi, t: (0,) * b.ndim),
            ],
            out_specs=pl.BlockSpec((1, tile, cout), lambda bi, t: (bi, t, 0)),
        ),
        compiler_params=pltpu.CompilerParams(
            dimension_semantics=("parallel", "parallel"),
            vmem_limit_bytes=_VMEM_LIMIT),
    )(xp, xp, w, b)


def pallas_conv1d(x, w_flat, b, *, K, dilation=1, pre_lrelu=False,
                  add_residual=False, max_tile=512):
    """x: (B, T, Cin) bf16; w_flat: (K*Cin, Cout) bf16 tap-major; b: (1, Cout) f32.
    'same' padded dilated conv, optionally with lrelu on the input and a fused
    residual add (HiFiGAN ResBlock step)."""
    B, T, Cin = x.shape
    Cout = w_flat.shape[1]
    pad = ((K - 1) // 2) * dilation
    halo = (K - 1) * dilation
    T_out = T + 2 * pad - halo
    if add_residual:
        assert T_out == T
    halo_pad = max(8, _round_up(halo, 8))
    tile = min(_round_up(max_tile, halo_pad), _round_up(T_out, halo_pad))
    nt = _cdiv(T_out, tile)
    T_in = nt * tile + halo_pad
    # TODO(synk): the pad (and the right alignment fill) is still one XLA pad op
    # in HBM; an in-kernel halo memset would remove this extra activation pass.
    xp = jnp.pad(x, ((0, 0), (pad, T_in - pad - T), (0, 0)))
    out = _call_conv(xp, w_flat, b,
                     offsets=tuple(k * dilation for k in range(K)),
                     tile=tile, nt=nt, pad_l=pad, pre_lrelu=pre_lrelu,
                     add_residual=add_residual, halo_pad=halo_pad, cout=Cout)
    return out[:, :T_out, :]


def pallas_conv_transpose1d(x, st, *, max_tile=512):
    """Polyphase ConvTranspose1d (+ fused input leaky-relu).  The per-phase taps
    were folded at init into one (union_taps*Cin, stride*Cout) weight; output
    phases land side-by-side in the channel axis and a free row-major reshape
    interleaves them in time."""
    B, T, Cin = x.shape
    s, K, p, Cout = st["stride"], st["kernel"], st["pad"], st["cout"]
    T_out = (T - 1) * s + K - 2 * p
    Tq = _cdiv(T_out, s)
    offsets, halo, L = st["offsets"], st["halo"], st["left_pad"]
    halo_pad = max(8, _round_up(max(halo, 1), 8))
    tile = min(_round_up(max_tile, halo_pad), _round_up(Tq, halo_pad))
    nt = _cdiv(Tq, tile)
    T_in = nt * tile + halo_pad
    right = T_in - L - T
    assert right >= 0
    xp = jnp.pad(x, ((0, 0), (L, right), (0, 0)))
    out = _call_conv(xp, st["w"], st["b"], offsets=offsets, tile=tile, nt=nt,
                     pad_l=0, pre_lrelu=True, add_residual=False,
                     halo_pad=halo_pad, cout=s * Cout)
    out = out.reshape(B, nt * tile * s, Cout)      # free row-major phase interleave
    return out[:, :T_out, :]


# ----------------------------------------------------------------------------
# Kernel 3: audio head.  Fuses: x + (sine-source * w_src + b_src)  ->  lrelu
#   -> conv_post (K taps, Cout = 1) -> tanh, computed with time on the lane
#   axis so the (B, 1, T_audio) output is written with lane-dense stores.
# ----------------------------------------------------------------------------
def _audio_head_kernel(xm_ref, xh_ref, sm_ref, sh_ref, wsrc_ref, bsrc_ref,
                       wpost_ref, bpost_ref, o_ref, *, K, tile):
    xwin = jnp.concatenate([xm_ref[0].astype(jnp.float32),
                            xh_ref[0].astype(jnp.float32)], axis=0)   # (tile+hp, C)
    swin = jnp.concatenate([sm_ref[0], sh_ref[0]], axis=0)            # (tile+hp, 1) f32
    # fused NSF source injection: rank-1 scale of the sine, pure VPU work.
    xin = xwin + swin * wsrc_ref[...] + bsrc_ref[...]
    xa = _lrelu(xin)
    # conv_post with time on lanes: (1, C) @ (tile, C)^T per tap -> (1, tile)
    y = jax.lax.dot_general(wpost_ref[0], xa[0:tile, :].astype(jnp.bfloat16),
                            (((1,), (1,)), ((), ())),
                            preferred_element_type=jnp.float32)
    for k in range(1, K):
        y += jax.lax.dot_general(wpost_ref[k], xa[k:k + tile, :].astype(jnp.bfloat16),
                                 (((1,), (1,)), ((), ())),
                                 preferred_element_type=jnp.float32)
    y = jnp.tanh(y + bpost_ref[...])
    o_ref[0] = y.astype(o_ref.dtype)                                  # (1, tile) lane-dense


def pallas_audio_head(x, sine, wsrc, bsrc, wpost, bpost, *, max_tile=2048):
    """x: (B, T, C) bf16; sine: (B, T, 1) f32; wpost: (K, 1, C) bf16.
    Returns audio in PyTorch layout (B, 1, T)."""
    B, T, C = x.shape
    K = wpost.shape[0]
    pad = (K - 1) // 2
    halo = K - 1
    halo_pad = max(8, _round_up(halo, 8))
    unit = (128 * halo_pad) // math.gcd(128, halo_pad)   # lane-dense + halo aligned
    tile = min(_round_up(max_tile, unit), _round_up(T, unit))
    nt = _cdiv(T, tile)
    T_in = nt * tile + halo_pad
    xp = jnp.pad(x, ((0, 0), (pad, T_in - pad - T), (0, 0)))
    sp = jnp.pad(sine, ((0, 0), (pad, T_in - pad - T), (0, 0)))
    hb = tile // halo_pad
    kern = functools.partial(_audio_head_kernel, K=K, tile=tile)
    out = pl.pallas_call(
        kern,
        out_shape=jax.ShapeDtypeStruct((B, 1, nt * tile), jnp.float32),
        grid_spec=pltpu.PrefetchScalarGridSpec(
            num_scalar_prefetch=0,
            grid=(B, nt),
            in_specs=[
                pl.BlockSpec((1, tile, C), lambda bi, t: (bi, t, 0)),
                pl.BlockSpec((1, halo_pad, C), lambda bi, t: (bi, (t + 1) * hb, 0)),
                pl.BlockSpec((1, tile, 1), lambda bi, t: (bi, t, 0)),
                pl.BlockSpec((1, halo_pad, 1), lambda bi, t: (bi, (t + 1) * hb, 0)),
                pl.BlockSpec((1, C), lambda bi, t: (0, 0)),
                pl.BlockSpec((1, C), lambda bi, t: (0, 0)),
                pl.BlockSpec((K, 1, C), lambda bi, t: (0, 0, 0)),
                pl.BlockSpec((1, 1), lambda bi, t: (0, 0)),
            ],
            out_specs=pl.BlockSpec((1, 1, tile), lambda bi, t: (bi, 0, t)),
        ),
        compiler_params=pltpu.CompilerParams(
            dimension_semantics=("parallel", "parallel"),
            vmem_limit_bytes=_VMEM_LIMIT),
    )(xp, xp, sp, sp, wsrc, bsrc, wpost, bpost)
    return out[:, :, :T]


# ----------------------------------------------------------------------------
# HiFiGAN-style generator (self.encoder)
# ----------------------------------------------------------------------------
def hifigan_generator(features, pitches, g):
    # features: (B, T, H) bf16 channels-last; pitches: (B, T, 1) f32
    x = pallas_conv1d(features, g["conv_pre_w"], g["conv_pre_b"], K=g["conv_pre_k"])
    for stage in g["ups"]:
        x = pallas_conv_transpose1d(x, stage)           # fused lrelu + polyphase upsample
        # TODO(synk): the two dilated ResBlock convs are still separate pallas_calls
        # (residual + lrelu fused); a full per-stage fusion with recompute halos
        # would remove one more activation round trip per stage.
        for (wf, bf, kz, d) in stage["res"]:
            x = pallas_conv1d(x, wf, bf, K=kz, dilation=d,
                              pre_lrelu=True, add_residual=True)

    # simplified NSF source: single sine excitation from f0 at the output rate.
    # TODO(synk): SourceModuleHnNSF (multi-harmonic sines + noise branch + per-stage
    # downsampled source convs) has no clean single-kernel equivalent; simplified here.
    f0_up = jnp.repeat(pitches, g["total_upsample"], axis=1)          # (B, T_audio, 1)
    cycles = jnp.cumsum(f0_up / g["sample_rate"], axis=1)             # sequential scan (glue)
    phase = 2.0 * jnp.pi * (cycles - jnp.floor(cycles))               # wrapped for f32 accuracy
    source = 0.1 * jnp.sin(phase)

    return pallas_audio_head(x, source, g["source_w"], g["source_b"],
                             g["conv_post_w"], g["conv_post_b"])      # (B, 1, T_audio)


# ----------------------------------------------------------------------------
# HiFiSinger.forward
# ----------------------------------------------------------------------------
def hifisinger_forward(params, speakers, contents, contents_lens, contents_max_len,
                       pitches, pitch_shift=None):
    B, T, _ = contents.shape
    assert T == contents_max_len

    # get_mask_from_lengths
    ids = jnp.arange(contents_max_len)[None, :]
    src_masks = ids >= contents_lens[:, None]                         # (B, T) bool
    keep = (1.0 - src_masks.astype(jnp.float32))[:, :, None]          # (B, T, 1)

    # speaker_encoder: embedding lookup (gather = glue)
    spk_embed = jnp.take(params["spk_table"], speakers, axis=0)[:, None, :]

    # pitch_shift_encoder: tiny Linear(1, H) (parameter-sized, glue)
    if pitch_shift is not None:
        ps_embed = (pitch_shift @ params["w_ps"] + params["b_ps"])[:, None, :]
    else:
        ps_embed = jnp.zeros((B, 1, params["hidden"]), jnp.float32)

    # TODO(synk): optional phones2mel gather and energy_encoder branches omitted (None inputs).

    features = fuse_features(contents.astype(jnp.bfloat16), spk_embed, ps_embed,
                             keep, params)                            # (B, T, H) bf16

    # HiFiGAN branch: encoder(features.transpose(1, 2), pitches[:, :, 0])
    return hifigan_generator(features, pitches[:, :, 0:1], params["gen"])


# ----------------------------------------------------------------------------
# deterministic parameter init (weight transforms precomputed once, here)
# ----------------------------------------------------------------------------
def _make_upsample_stage(w_t, b, *, stride, padding):
    """Fold a PyTorch ConvTranspose1d weight (Cin, Cout, K) into its polyphase
    form: one (union_taps*Cin, stride*Cout) matrix whose column group r holds
    phase r's taps (zero blocks where a phase has no tap at that offset)."""
    Cin, Cout, K = w_t.shape
    phases = []
    for r in range(stride):
        taps = sorted(((r + padding - k) // stride, k)
                      for k in range(K) if (r + padding - k) % stride == 0)
        phases.append(taps)
    deltas = [d for taps in phases for d, _ in taps]
    d_min, d_max = min(deltas), max(deltas)
    L = -d_min
    union = sorted({d for d in deltas})
    zeros = jnp.zeros((Cin, Cout), w_t.dtype)
    row_blocks = []
    for d in union:
        cols = []
        for taps in phases:
            match = [k for dd, k in taps if dd == d]
            cols.append(w_t[:, :, match[0]] if match else zeros)
        row_blocks.append(jnp.concatenate(cols, axis=1))              # (Cin, stride*Cout)
    w_comb = jnp.concatenate(row_blocks, axis=0)                      # (u*Cin, stride*Cout)
    b_comb = jnp.tile(b, (1, stride))                                 # (1, stride*Cout)
    return dict(stride=stride, kernel=K, pad=padding, cout=Cout,
                w=w_comb.astype(jnp.bfloat16), b=b_comb.astype(jnp.float32),
                offsets=tuple(d + L for d in union),
                left_pad=L, halo=d_max - d_min)


def init_params(key, *, in_dim=32, hidden=32, num_speakers=4,
                up_c0=32, up_rates=(2, 2), up_kernels=(4, 4),
                res_kernel=3, res_dilations=(1, 3), sample_rate=16000):
    keys = iter(jax.random.split(key, 64))
    bf16 = jnp.bfloat16

    def nrm(shape, scale=0.1, dtype=jnp.float32):
        return (scale * jax.random.normal(next(keys), shape)).astype(dtype)

    p = dict(hidden=hidden)
    p["w_text"] = nrm((in_dim, hidden), dtype=bf16);  p["b_text"] = nrm((1, hidden))
    p["spk_table"] = nrm((num_speakers, hidden))
    p["w_ps"] = nrm((1, hidden));                     p["b_ps"] = nrm((hidden,))
    p["w_fuse1"] = nrm((hidden, hidden), dtype=bf16); p["b_fuse1"] = nrm((1, hidden))
    p["w_fuse2"] = nrm((hidden, hidden), dtype=bf16); p["b_fuse2"] = nrm((1, hidden))

    gen = dict(sample_rate=float(sample_rate), total_upsample=1, conv_pre_k=7)
    gen["conv_pre_w"] = nrm((7, hidden, up_c0)).reshape(7 * hidden, up_c0).astype(bf16)
    gen["conv_pre_b"] = nrm((1, up_c0))
    ups, c = [], up_c0
    for r, kz in zip(up_rates, up_kernels):
        c_out = c // 2
        stage = _make_upsample_stage(nrm((c, c_out, kz)),             # PyTorch (Cin,Cout,K)
                                     nrm((1, c_out)),
                                     stride=r, padding=(kz - r) // 2)
        stage["res"] = [
            (nrm((res_kernel, c_out, c_out)).reshape(res_kernel * c_out, c_out).astype(bf16),
             nrm((1, c_out)), res_kernel, d)
            for d in res_dilations
        ]
        ups.append(stage)
        c = c_out
        gen["total_upsample"] *= r
    gen["ups"] = ups
    gen["source_w"] = nrm((1, c))                                     # Conv1d(1, C, 1) weight
    gen["source_b"] = nrm((1, c))
    # conv_post stored tap-major as (K, 1, Cin) for the time-on-lanes matmul.
    gen["conv_post_w"] = jnp.transpose(nrm((7, c, 1)), (0, 2, 1)).astype(bf16)
    gen["conv_post_b"] = nrm((1, 1))
    p["gen"] = gen
    return p


# ----------------------------------------------------------------------------
if __name__ == "__main__":
    B, T, IN_DIM, HIDDEN = 2, 8, 32, 32

    key = jax.random.PRNGKey(0)
    k_par, k_c, k_f0, k_ps = jax.random.split(key, 4)

    params = init_params(k_par, in_dim=IN_DIM, hidden=HIDDEN)

    speakers = jnp.array([0, 1], dtype=jnp.int32)                     # (B,)
    contents = jax.random.normal(k_c, (B, T, IN_DIM), jnp.float32)    # (B, T, in_dim)
    contents_lens = jnp.array([8, 6], dtype=jnp.int32)                # (B,)
    contents_max_len = T
    pitches = 100.0 + 200.0 * jax.random.uniform(k_f0, (B, T, 1), jnp.float32)
    pitch_shift = jax.random.normal(k_ps, (B, 1), jnp.float32)

    audio = hifisinger_forward(params, speakers, contents, contents_lens,
                               contents_max_len, pitches, pitch_shift)
    audio = jax.block_until_ready(audio)

    total_up = params["gen"]["total_upsample"]
    assert audio.shape == (B, 1, T * total_up), audio.shape
    assert jnp.all(jnp.isfinite(audio))
    print("KERNEL_OK")
</pallas_src>

<mosaic_0001>
module attributes {stable_mosaic.version = 11 : i64} {
  func.func @_features_kernel(%arg0: i32, %arg1: memref<1x8x32xbf16, #tpu.memory_space<vmem>>, %arg2: memref<1x1x32xf32, #tpu.memory_space<vmem>>, %arg3: memref<1x1x32xf32, #tpu.memory_space<vmem>>, %arg4: memref<1x8x1xf32, #tpu.memory_space<vmem>>, %arg5: memref<32x32xbf16, #tpu.memory_space<vmem>>, %arg6: memref<1x32xf32, #tpu.memory_space<vmem>>, %arg7: memref<32x32xbf16, #tpu.memory_space<vmem>>, %arg8: memref<1x32xf32, #tpu.memory_space<vmem>>, %arg9: memref<32x32xbf16, #tpu.memory_space<vmem>>, %arg10: memref<1x32xf32, #tpu.memory_space<vmem>>, %arg11: memref<1x8x32xbf16, #tpu.memory_space<vmem>>) attributes {dimension_semantics = [#tpu.dimension_semantics<parallel>], iteration_bounds = array<i64: 2>, scalar_prefetch = 0 : i64, scratch_operands = 0 : i64, tpu.core_type = #tpu.core_type<tc>, window_params = [{transform_indices = @transform_0, window_bounds = array<i64: 1, 8, 32>}, {transform_indices = @transform_1, window_bounds = array<i64: 1, 1, 32>}, {transform_indices = @transform_2, window_bounds = array<i64: 1, 1, 32>}, {transform_indices = @transform_3, window_bounds = array<i64: 1, 8, 1>}, {pipeline_mode = #tpu.pipeline_mode<synchronous>, transform_indices = @transform_4, window_bounds = array<i64: 32, 32>}, {pipeline_mode = #tpu.pipeline_mode<synchronous>, transform_indices = @transform_5, window_bounds = array<i64: 1, 32>}, {pipeline_mode = #tpu.pipeline_mode<synchronous>, transform_indices = @transform_6, window_bounds = array<i64: 32, 32>}, {pipeline_mode = #tpu.pipeline_mode<synchronous>, transform_indices = @transform_7, window_bounds = array<i64: 1, 32>}, {pipeline_mode = #tpu.pipeline_mode<synchronous>, transform_indices = @transform_8, window_bounds = array<i64: 32, 32>}, {pipeline_mode = #tpu.pipeline_mode<synchronous>, transform_indices = @transform_9, window_bounds = array<i64: 1, 32>}, {transform_indices = @transform_10, window_bounds = array<i64: 1, 8, 32>}]} {
    %c0 = arith.constant 0 : index
    %c0_0 = arith.constant 0 : index
    %c0_1 = arith.constant 0 : index
    %0 = vector.load %arg1[%c0, %c0_0, %c0_1] : memref<1x8x32xbf16, #tpu.memory_space<vmem>>, vector<1x8x32xbf16>
    %1 = vector.shape_cast %0 : vector<1x8x32xbf16> to vector<8x32xbf16>
    %c0_2 = arith.constant 0 : index
    %c0_3 = arith.constant 0 : index
    %2 = vector.load %arg5[%c0_2, %c0_3] : memref<32x32xbf16, #tpu.memory_space<vmem>>, vector<32x32xbf16>
    %cst = arith.constant dense<0.000000e+00> : vector<8x32xf32>
    %3 = tpu.matmul %1, %2, %cst {dimension_numbers = #tpu.dot_dimension_numbers<[1], [0], [0], [1], [0, 0, 1, 1], [], []>} : vector<8x32xbf16>, vector<32x32xbf16>, vector<8x32xf32> -> vector<8x32xf32>
    %c0_4 = arith.constant 0 : index
    %c0_5 = arith.constant 0 : index
    %4 = vector.load %arg6[%c0_4, %c0_5] : memref<1x32xf32, #tpu.memory_space<vmem>>, vector<1x32xf32>
    %5 = vector.broadcast %4 : vector<1x32xf32> to vector<8x32xf32>
    %6 = arith.addf %3, %5 : vector<8x32xf32>
    %c0_6 = arith.constant 0 : index
    %c0_7 = arith.constant 0 : index
    %c0_8 = arith.constant 0 : index
    %7 = vector.load %arg2[%c0_6, %c0_7, %c0_8] : memref<1x1x32xf32, #tpu.memory_space<vmem>>, vector<1x1x32xf32>
    %8 = vector.shape_cast %7 : vector<1x1x32xf32> to vector<1x32xf32>
    %9 = vector.broadcast %8 : vector<1x32xf32> to vector<8x32xf32>
    %10 = arith.addf %6, %9 : vector<8x32xf32>
    %c0_9 = arith.constant 0 : index
    %c0_10 = arith.constant 0 : index
    %c0_11 = arith.constant 0 : index
    %11 = vector.load %arg3[%c0_9, %c0_10, %c0_11] : memref<1x1x32xf32, #tpu.memory_space<vmem>>, vector<1x1x32xf32>
    %12 = vector.shape_cast %11 : vector<1x1x32xf32> to vector<1x32xf32>
    %13 = vector.broadcast %12 : vector<1x32xf32> to vector<8x32xf32>
    %14 = arith.addf %10, %13 : vector<8x32xf32>
    %15 = arith.truncf %14 : vector<8x32xf32> to vector<8x32xbf16>
    %c0_12 = arith.constant 0 : index
    %c0_13 = arith.constant 0 : index
    %16 = vector.load %arg7[%c0_12, %c0_13] : memref<32x32xbf16, #tpu.memory_space<vmem>>, vector<32x32xbf16>
    %cst_14 = arith.constant dense<0.000000e+00> : vector<8x32xf32>
    %17 = tpu.matmul %15, %16, %cst_14 {dimension_numbers = #tpu.dot_dimension_numbers<[1], [0], [0], [1], [0, 0, 1, 1], [], []>} : vector<8x32xbf16>, vector<32x32xbf16>, vector<8x32xf32> -> vector<8x32xf32>
    %c0_15 = arith.constant 0 : index
    %c0_16 = arith.constant 0 : index
    %18 = vector.load %arg8[%c0_15, %c0_16] : memref<1x32xf32, #tpu.memory_space<vmem>>, vector<1x32xf32>
    %19 = vector.broadcast %18 : vector<1x32xf32> to vector<8x32xf32>
    %20 = arith.addf %17, %19 : vector<8x32xf32>
    %21 = arith.negf %20 : vector<8x32xf32>
    %22 = math.exp %21 : vector<8x32xf32>
    %cst_17 = arith.constant 1.000000e+00 : f32
    %23 = vector.broadcast %cst_17 : f32 to vector<8x32xf32>
    %24 = arith.addf %23, %22 : vector<8x32xf32>
    %25 = arith.divf %23, %24 : vector<8x32xf32>
    %26 = arith.mulf %20, %25 : vector<8x32xf32>
    %27 = arith.truncf %26 : vector<8x32xf32> to vector<8x32xbf16>
    %c0_18 = arith.constant 0 : index
    %c0_19 = arith.constant 0 : index
    %28 = vector.load %arg9[%c0_18, %c0_19] : memref<32x32xbf16, #tpu.memory_space<vmem>>, vector<32x32xbf16>
    %cst_20 = arith.constant dense<0.000000e+00> : vector<8x32xf32>
    %29 = tpu.matmul %27, %28, %cst_20 {dimension_numbers = #tpu.dot_dimension_numbers<[1], [0], [0], [1], [0, 0, 1, 1], [], []>} : vector<8x32xbf16>, vector<32x32xbf16>, vector<8x32xf32> -> vector<8x32xf32>
    %c0_21 = arith.constant 0 : index
    %c0_22 = arith.constant 0 : index
    %30 = vector.load %arg10[%c0_21, %c0_22] : memref<1x32xf32, #tpu.memory_space<vmem>>, vector<1x32xf32>
    %31 = vector.broadcast %30 : vector<1x32xf32> to vector<8x32xf32>
    %32 = arith.addf %29, %31 : vector<8x32xf32>
    %33 = arith.negf %32 : vector<8x32xf32>
    %34 = math.exp %33 : vector<8x32xf32>
    %cst_23 = arith.constant 1.000000e+00 : f32
    %35 = vector.broadcast %cst_23 : f32 to vector<8x32xf32>
    %36 = arith.addf %35, %34 : vector<8x32xf32>
    %37 = arith.divf %35, %36 : vector<8x32xf32>
    %38 = arith.mulf %32, %37 : vector<8x32xf32>
    %c0_24 = arith.constant 0 : index
    %c0_25 = arith.constant 0 : index
    %c0_26 = arith.constant 0 : index
    %39 = vector.load %arg4[%c0_24, %c0_25, %c0_26] : memref<1x8x1xf32, #tpu.memory_space<vmem>>, vector<1x8x1xf32>
    %40 = vector.shape_cast %39 : vector<1x8x1xf32> to vector<8x1xf32>
    %41 = vector.broadcast %40 : vector<8x1xf32> to vector<8x32xf32>
    %42 = arith.mulf %38, %41 : vector<8x32xf32>
    %43 = arith.truncf %42 : vector<8x32xf32> to vector<8x32xbf16>
    %c0_27 = arith.constant 0 : index
    %c0_28 = arith.constant 0 : index
    %c0_29 = arith.constant 0 : index
    %44 = vector.load %arg11[%c0_27, %c0_28, %c0_29] : memref<1x8x32xbf16, #tpu.memory_space<vmem>>, vector<1x8x32xbf16>
    %45 = vector.shape_cast %44 : vector<1x8x32xbf16> to vector<8x32xbf16>
    %46 = vector.shape_cast %43 : vector<8x32xbf16> to vector<1x8x32xbf16>
    tpu.vector_store %arg11[%c0_27, %c0_28, %c0_29], %46 {strides = array<i32>} : memref<1x8x32xbf16, #tpu.memory_space<vmem>>, vector<1x8x32xbf16>,
    return
  }
  func.func @transform_0(%arg0: i32) -> (i32, i32, i32) {
    %c0_i32 = arith.constant 0 : i32
    %c0_i32_0 = arith.constant 0 : i32
    %c0_i32_1 = arith.constant 0 : i32
    return %arg0, %c0_i32, %c0_i32_0 : i32, i32, i32
  }
  func.func @transform_1(%arg0: i32) -> (i32, i32, i32) {
    %c0_i32 = arith.constant 0 : i32
    %c0_i32_0 = arith.constant 0 : i32
    %c0_i32_1 = arith.constant 0 : i32
    return %arg0, %c0_i32, %c0_i32_0 : i32, i32, i32
  }
  func.func @transform_2(%arg0: i32) -> (i32, i32, i32) {
    %c0_i32 = arith.constant 0 : i32
    %c0_i32_0 = arith.constant 0 : i32
    %c0_i32_1 = arith.constant 0 : i32
    return %arg0, %c0_i32, %c0_i32_0 : i32, i32, i32
  }
  func.func @transform_3(%arg0: i32) -> (i32, i32, i32) {
    %c0_i32 = arith.constant 0 : i32
    %c0_i32_0 = arith.constant 0 : i32
    %c0_i32_1 = arith.constant 0 : i32
    return %arg0, %c0_i32, %c0_i32_0 : i32, i32, i32
  }
  func.func @transform_4(%arg0: i32) -> (i32, i32) {
    %c0_i32 = arith.constant 0 : i32
    %c0_i32_0 = arith.constant 0 : i32
    %c0_i32_1 = arith.constant 0 : i32
    return %c0_i32, %c0_i32_0 : i32, i32
  }
  func.func @transform_5(%arg0: i32) -> (i32, i32) {
    %c0_i32 = arith.constant 0 : i32
    %c0_i32_0 = arith.constant 0 : i32
    %c0_i32_1 = arith.constant 0 : i32
    return %c0_i32, %c0_i32_0 : i32, i32
  }
  func.func @transform_6(%arg0: i32) -> (i32, i32) {
    %c0_i32 = arith.constant 0 : i32
    %c0_i32_0 = arith.constant 0 : i32
    %c0_i32_1 = arith.constant 0 : i32
    return %c0_i32, %c0_i32_0 : i32, i32
  }
  func.func @transform_7(%arg0: i32) -> (i32, i32) {
    %c0_i32 = arith.constant 0 : i32
    %c0_i32_0 = arith.constant 0 : i32
    %c0_i32_1 = arith.constant 0 : i32
    return %c0_i32, %c0_i32_0 : i32, i32
  }
  func.func @transform_8(%arg0: i32) -> (i32, i32) {
    %c0_i32 = arith.constant 0 : i32
    %c0_i32_0 = arith.constant 0 : i32
    %c0_i32_1 = arith.constant 0 : i32
    return %c0_i32, %c0_i32_0 : i32, i32
  }
  func.func @transform_9(%arg0: i32) -> (i32, i32) {
    %c0_i32 = arith.constant 0 : i32
    %c0_i32_0 = arith.constant 0 : i32
    %c0_i32_1 = arith.constant 0 : i32
    return %c0_i32, %c0_i32_0 : i32, i32
  }
  func.func @transform_10(%arg0: i32) -> (i32, i32, i32) {
    %c0_i32 = arith.constant 0 : i32
    %c0_i32_0 = arith.constant 0 : i32
    %c0_i32_1 = arith.constant 0 : i32
    return %arg0, %c0_i32, %c0_i32_0 : i32, i32, i32
  }
}

</mosaic_0001>

<bundles_post_ra>
// kernel: tpu_custom_call.1
= control target key start
LH: loop header
LB: loop body
LE: loop exit
PB: predicated region body
PF: predicated region fallthrough
CT: control target
= control target key end

     0   :  { %s1665_s0 = inlined_call_operand.hbm [shape: bf16[2,8,32], index: 0, kind: input, shape index: {}]   ;;  %s1666_s1 = inlined_call_operand.hbm [shape: f32[2,1,32], index: 1, kind: input, shape index: {}]   ;;  %s1667_s2 = inlined_call_operand.hbm [shape: f32[2,1,32], index: 2, kind: input, shape index: {}]   ;;  %s1668_s3 = inlined_call_operand.vmem [shape: f32[2,8,1], index: 3, kind: input, shape index: {}]   ;;  %s1669_s4 = inlined_call_operand.vmem [shape: bf16[32,32], index: 4, kind: input, shape index: {}]   ;;  %s1670_s5 = inlined_call_operand.hbm [shape: f32[1,32], index: 5, kind: input, shape index: {}]   ;;  %s1671_s6 = inlined_call_operand.hbm [shape: bf16[32,32], index: 6, kind: input, shape index: {}]   ;;  %s1672_s7 = inlined_call_operand.hbm [shape: f32[1,32], index: 7, kind: input, shape index: {}]   ;;  %s1673_s8 = inlined_call_operand.vmem [shape: bf16[32,32], index: 8, kind: input, shape index: {}]   ;;  %s1674_s9 = inlined_call_operand.vmem [shape: f32[1,32], index: 9, kind: input, shape index: {}]   ;;  %s1675_s10 = inlined_call_operand.hbm [shape: bf16[2,8,32], index: 10, kind: output, shape index: {}]  }
   0x1   :  { %1692 = sst [smem:[#allocation25_spill]] %s1665_s0 }
   0x2   :  { %1693 = sst [smem:[#allocation26_spill]] %s1666_s1 }
   0x3   :  { %1694 = sst [smem:[#allocation27_spill]] %s1670_s5 }
   0x4   :  { %1695 = sst [smem:[#allocation28_spill]] %s1675_s10 }
   0x5   :  { %15 = vsyncpa [#allocation3], 0 }
   0x6   :  { %17 = vsyncpa [#allocation3 + $0x1], 0 }
   0x7   :  { %18 = vsyncpa [#allocation6], 0 }
   0x8   :  { %20 = vsyncpa [#allocation6 + $0x1], 0 }
   0x9   :  { %21 = vsyncpa [#allocation9], 0 }
   0xa   :  { %22 = vsyncpa [#allocation12], 0 }
   0xb   :  { %23 = vsyncpa [#allocation4], 0 }
   0xc   :  { %25 = vsyncpa [#allocation4 + $0x1], 0  ;;  %s1386_s13 = smov 0   ;;  %s1388_s14 = smov 0  }
   0xd   :  { %s1390_s15 = smov 0   ;;  %s1392_s16 = smov 0  }
   0xe LB: > { %1696 = sst [smem:[#allocation19_spill]] %s1305_s13  ;;  %s1407_s17 = sadd.s32 4294967295, %s1317_s16   ;;  %s1317_s16 = sphi %s1392_s16, %s1732_s16   ;;  %s1313_s15 = sphi %s1390_s15, %s1734_s15   ;;  %s1309_s14 = sphi %s1388_s14, %s1736_s14   ;;  %s1305_s13 = sphi %s1386_s13, %s1735_s13  }
   0xf   : > { %1697 = sst [smem:[#allocation20_spill]] %s1313_s15  ;;  %s902_s18 = sadd.s32 4294967294, %s1317_s16  }
  0x10   : > { %p51_p0 = scmp.ne.s32.totalorder %s1309_s14, %s1305_s13  ;;  %p1676_p1 = scmp.eq.s32.totalorder %s1407_s17, 0 }
  0x11   : > { %p285_p3 = scmp.eq.s32.totalorder %s902_s18, 1  ;;  %p903_p5 = scmp.ge.s32.totalorder %s1317_s16, 1 }
  0x12   : > { %p1416_p4 = por %p1676_p1, %p51_p0  ;;  %p292_p7 = scmp.lt.s32.totalorder %s1317_s16, 3 }
  0x13   : > { %p1421_p6 = por %p285_p3, %p51_p0  ;;  %s1319_s22 = smov [#allocation8]  }
  0x14   : > { %s1698_s19 = scalar_select %p1416_p4, 1, 0 }
  0x15   : > { %s1699_s20 = scalar_select %p1421_p6, 1, 0 }
  0x16   : > { %p1426_p8 = pnand %p903_p5, %p292_p7  ;;  %s308_s23 = sshll.u32 %s1319_s22, 4  ;;  %s309_s23 = int_to_ptr.vmem [resolvable:$true] %s308_s23 }
  0x17   : > { %1700 = sst [smem:[#allocation21_spill]] %s1699_s20  ;;  %s1434_s24 = sadd.s32 1, %s1317_s16  }
  0x18   : > { %s1701_s21 = scalar_select %p1426_p8, 1, 0 }
  0x19   : > { %p992_p10 = pneg %p1426_p8  ;;  %1702 = sst [smem:[#allocation22_spill]] %s1434_s24 }
  0x1a   : > { %s35_s26 = ssub.s32 %s1317_s16, %s1434_s24  ;;  %s38_s28 = sadd.s32 1, %s1313_s15 }
  0x1b   : > { %p1438_p11 = pnand %p992_p10, %p1676_p1  ;;  %p1444_p12 = scmp.eq.s32.totalorder %s35_s26, 0 }
  0x1c   : > { %p45_p13 = scmp.ne.s32.totalorder %s1313_s15, %s1309_s14  ;;  %s1090_s29 = scalar_lea.vmem %s309_s23, 16 }
  0x1d   : > { %s1703_s25 = scalar_select %p1438_p11, 1, 0 }
  0x1e   : > { %p1682_p0 = pneg %p1438_p11  ;;  %p1091_p3 = scmp.ne.s32.totalorder %s309_s23, %s1090_s29 }
  0x1f   : > { %s1097_s30 = scalar_lea.vmem %s309_s23, 32  ;;  %p1098_p10 = scmp.lt.s32.totalorder %s309_s23, %s309_s23 }
  0x20   : > { %p1093_p5 = pnand %p1091_p3, %p1682_p0  ;;  %p1099_p9 = scmp.lt.s32.totalorder %s1097_s30, %s1090_s29 }
  0x22   : > { %p1094_p7 = pneg %p1093_p5  ;;  %p1100_p1 = por %p1099_p9, %p1098_p10 }
  0x24   : > { %p1101_p2 = pnand %p1100_p1, %p1094_p7 }
  0x26   : > { %1104 = shalt.err (!%p1101_p2)
}
  0x27   : > { %s1705_s5 = sld [smem:[#allocation27_spill]]  ;;  %p46_p1 = scmp.eq.s32.totalorder %s1317_s16, 0 }
  0x28   : > { %s1464_s18 = scalar_select %p1444_p12, %s1313_s15, %s38_s28  }
  0x29   : > { %p1707_p2 = scmp.eq.s32.totalorder %s1407_s17, 1  ;;  %p1019_p3 = scmp.lt.s32.totalorder %s1317_s16, 2 }
  0x2a   : > { %1706 = sst [smem:[#allocation23_spill]] %s1464_s18  ;;  %s1478_s26 = sand.u32 1, %s1313_s15  }
  0x2b   : > { %p1472_p9 = por %p1707_p2, %p45_p13  ;;  %p47_p5 = por %p46_p1, %p45_p13 }
  0x2c   : > { %s367_s29 = sand.u32 1, %s1317_s16   ;;  %s1711_s1 = sld [smem:[#allocation26_spill]] }
  0x2d   : > { %995 = dma.hbm_to_vmem [thread:$0]  (!%p1438_p11), %s1705_s5, 16, %s309_s23, [#allocation9]  }
  0x2e   : > { %s1708_s22 = scalar_select %p1472_p9, 1, 0 }
  0x2f   : > { %p1484_p7 = pnand %p1019_p3, %p47_p5  ;;  %s1680_s23 = sshll.u32 %s1317_s16, 4 }
  0x30   : > { %1709 = sst [smem:[#allocation24_spill]] %s1708_s22  ;;  %s370_s12 = scalar_lea.vmem [#allocation5], %s1478_s26 }
  0x31   : > { %s377_s5 = sshll.u32 %s370_s12, 4  ;;  %s1497_s18 = scalar_lea.sflag [#allocation6], %s367_s29  ;;  %s378_s5 = int_to_ptr.vmem [resolvable:$true] %s377_s5 }
  0x32   : > { %s1494_s11 = scalar_lea.hbm %s1711_s1, %s1680_s23  ;;  %p1503_p13 = pneg %p1484_p7 }
  0x33   : > { %s1105_s15 = scalar_lea.hbm %s1494_s11, 16  ;;  %s1110_s23 = scalar_lea.hbm %s1711_s1, 32 }
  0x34   : > { %p1106_p12 = scmp.ne.s32.totalorder %s1494_s11, %s1105_s15  ;;  %p1111_p2 = scmp.lt.s32.totalorder %s1494_s11, %s1711_s1 }
  0x35   : > { %p1112_p3 = scmp.lt.s32.totalorder %s1110_s23, %s1105_s15 }
  0x36   : > { %p1108_p10 = pnand %p1503_p13, %p1106_p12 }
  0x37   : > { %p1113_p5 = por %p1112_p3, %p1111_p2 }
  0x38   : > { %p1109_p1 = pneg %p1108_p10 }
  0x3a   : > { %p1114_p0 = pnand %p1113_p5, %p1109_p1 }
  0x3c   : > { %1117 = shalt.err (!%p1114_p0)
}
  0x3d   : > { %s1118_s29 = scalar_lea.vmem %s378_s5, 16  ;;  %s1320_s13 = smov [#allocation5]  }
  0x3e   : > { %p1119_p6 = scmp.ne.s32.totalorder %s378_s5, %s1118_s29  ;;  %s1123_s10 = sshll.u32 %s1320_s13, 4  ;;  %s1124_s10 = int_to_ptr.vmem [resolvable:$false] %s1123_s10 }
  0x3f   : > { %s1125_s22 = scalar_lea.vmem %s1124_s10, 32  ;;  %p1126_p12 = scmp.lt.s32.totalorder %s378_s5, %s1124_s10 }
  0x40   : > { %p1121_p9 = pnand %p1119_p6, %p1503_p13  ;;  %p1127_p10 = scmp.lt.s32.totalorder %s1125_s22, %s1118_s29 }
  0x42   : > { %p1122_p4 = pneg %p1121_p9  ;;  %p1128_p8 = por %p1127_p10, %p1126_p12 }
  0x44   : > { %p1129_p11 = pnand %p1128_p8, %p1122_p4 }
  0x46   : > { %1132 = shalt.err (!%p1129_p11)
}
  0x47   : > { %1008 = dma.hbm_to_vmem [thread:$0]  (!%p1484_p7), %s1494_s11, 16, %s378_s5, %s1497_s18  }
  0x48   : > { %s1321_s15 = smov [#allocation10]   ;;  %p1713_p0 = scmp.ne.s32.totalorder %s1703_s25, 0 }
  0x49   : > { %s318_s20 = sshll.u32 %s1321_s15, 4  ;;  %s319_s20 = int_to_ptr.vmem [resolvable:$true] %s318_s20 }
  0x4a   : > { %s1144_s23 = scalar_lea.vmem %s319_s20, 256  ;;  %p1714_p9 = pneg %p1713_p0 }
  0x4b   : > { %p1145_p6 = scmp.ne.s32.totalorder %s319_s20, %s1144_s23  ;;  %p1152_p3 = scmp.lt.s32.totalorder %s319_s20, %s319_s20 }
  0x4c   : > { %p1153_p5 = scmp.lt.s32.totalorder %s1144_s23, %s1144_s23 }
  0x4d   : > { %p1147_p1 = pnand %p1145_p6, %p1714_p9 }
  0x4e   : > { %p1154_p12 = por %p1153_p5, %p1152_p3 }
  0x4f   : > { %p1148_p2 = pneg %p1147_p1 }
  0x51   : > { %p1155_p4 = pnand %p1154_p12, %p1148_p2 }
  0x53   : > { %1158 = shalt.err (!%p1155_p4)
}
  0x54   : > { %s1322_s10 = smov 64   ;;  %s1323_s13 = smov 4  }
  0x55   : > { %998 = dma.hbm_to_vmem [thread:$0]  (!%p1713_p0), %s1671_s6, 256, %s319_s20, [#allocation9], %s1322_s10, %s1322_s10, %s1323_s13  }
  0x56   : > { %s1324_s11 = smov [#allocation11]   ;;  %s908_s28 = sshll.u32 %s1478_s26, 2 }
  0x57   : > { %s332_s27 = sshll.u32 %s1324_s11, 4  ;;  %p1715_p11 = pmov %p1714_p9  ;;  %s333_s27 = int_to_ptr.vmem [resolvable:$true] %s332_s27 }
  0x58   : > { %s1170_s12 = scalar_lea.vmem %s333_s27, 16  ;;  %s1177_s29 = scalar_lea.vmem %s333_s27, 32 }
  0x59   : > { %p1171_p8 = scmp.ne.s32.totalorder %s333_s27, %s1170_s12  ;;  %p1178_p9 = scmp.lt.s32.totalorder %s333_s27, %s333_s27 }
  0x5a   : > { %p1179_p1 = scmp.lt.s32.totalorder %s1177_s29, %s1170_s12 }
  0x5b   : > { %p1173_p10 = pnand %p1171_p8, %p1715_p11 }
  0x5c   : > { %p1180_p2 = por %p1179_p1, %p1178_p9 }
  0x5d   : > { %p1174_p6 = pneg %p1173_p10 }
  0x5f   : > { %p1181_p3 = pnand %p1180_p2, %p1174_p6 }
  0x61   : > { %1184 = shalt.err (!%p1181_p3)
}
  0x62   : > { %1001 = dma.hbm_to_vmem [thread:$0]  (!%p1713_p0), %s1672_s7, 16, %s333_s27, [#allocation12]  }
  0x63   : > { %s909_s23 = sshll.u32 %s1317_s16, 6  ;;  %s353_s10 = scalar_lea.vmem [#allocation2], %s908_s28 }
  0x64   : > { %s360_s13 = sshll.u32 %s353_s10, 4  ;;  %s1716_s0 = sld [smem:[#allocation25_spill]]  ;;  %s361_s13 = int_to_ptr.vmem [resolvable:$true] %s360_s13 }
  0x65   : > { %s350_s12 = scalar_lea.sflag [#allocation3], %s1478_s26 }
  0x6a   : > { %s358_s11 = scalar_lea.hbm %s1716_s0, %s909_s23  ;;  %s1190_s20 = scalar_lea.hbm %s1716_s0, 128 }
  0x6b   : > { %s1185_s29 = scalar_lea.hbm %s358_s11, 64  ;;  %p1191_p0 = scmp.lt.s32.totalorder %s358_s11, %s1716_s0 }
  0x6c   : > { %p1186_p5 = scmp.ne.s32.totalorder %s358_s11, %s1185_s29  ;;  %p1192_p8 = scmp.lt.s32.totalorder %s1190_s20, %s1185_s29 }
  0x6e   : > { %p1188_p12 = pnand %p1186_p5, %p1503_p13  ;;  %p1193_p11 = por %p1192_p8, %p1191_p0 }
  0x70   : > { %p1189_p4 = pneg %p1188_p12 }
  0x72   : > { %p1194_p10 = pnand %p1193_p11, %p1189_p4 }
  0x74   : > { %1197 = shalt.err (!%p1194_p10)
}
  0x75   : > { %s1198_s28 = scalar_lea.vmem %s361_s13, 64  ;;  %s1325_s23 = smov [#allocation2]  }
  0x76   : > { %p1199_p6 = scmp.ne.s32.totalorder %s361_s13, %s1198_s28  ;;  %s1203_s10 = sshll.u32 %s1325_s23, 4  ;;  %s1204_s10 = int_to_ptr.vmem [resolvable:$false] %s1203_s10 }
  0x77   : > { %s1205_s5 = scalar_lea.vmem %s1204_s10, 128  ;;  %p1206_p2 = scmp.lt.s32.totalorder %s361_s13, %s1204_s10 }
  0x78   : > { %p1201_p9 = pnand %p1199_p6, %p1503_p13  ;;  %p1207_p3 = scmp.lt.s32.totalorder %s1205_s5, %s1198_s28 }
  0x7a   : > { %p1202_p1 = pneg %p1201_p9  ;;  %p1208_p5 = por %p1207_p3, %p1206_p2 }
  0x7c   : > { %p1209_p12 = pnand %p1208_p5, %p1202_p1 }
  0x7e   : > { %1212 = shalt.err (!%p1209_p12)
}
  0x7f   : > { %1005 = dma.hbm_to_vmem [thread:$0]  (!%p1484_p7), %s358_s11, 64, %s361_s13, %s350_s12  }
  0x80   : > { %s1717_s1 = sshll.u32 %s1317_s16, 4  ;;  %s387_s15 = scalar_lea.vmem [#allocation7], %s1478_s26 }
  0x81   : > { %s392_s25 = scalar_lea.hbm %s1667_s2, %s1717_s1  ;;  %s394_s20 = sshll.u32 %s387_s15, 4  ;;  %s395_s20 = int_to_ptr.vmem [resolvable:$true] %s394_s20 }
  0x82   : > { %s1213_s27 = scalar_lea.hbm %s392_s25, 16  ;;  %s1218_s10 = scalar_lea.hbm %s1667_s2, 32 }
  0x83   : > { %p1214_p4 = scmp.ne.s32.totalorder %s392_s25, %s1213_s27  ;;  %p1219_p11 = scmp.lt.s32.totalorder %s392_s25, %s1667_s2 }
  0x84   : > { %p1220_p10 = scmp.lt.s32.totalorder %s1218_s10, %s1213_s27 }
  0x85   : > { %p1216_p0 = pnand %p1214_p4, %p1503_p13 }
  0x86   : > { %p1221_p6 = por %p1220_p10, %p1219_p11 }
  0x87   : > { %p1217_p8 = pneg %p1216_p0 }
  0x89   : > { %p1222_p9 = pnand %p1221_p6, %p1217_p8 }
  0x8b   : > { %1225 = shalt.err (!%p1222_p9)
}
  0x8c   : > { %s1226_s26 = scalar_lea.vmem %s395_s20, 16  ;;  %s1326_s13 = smov [#allocation7]  }
  0x8d   : > { %p1227_p1 = scmp.ne.s32.totalorder %s395_s20, %s1226_s26  ;;  %s1231_s11 = sshll.u32 %s1326_s13, 4  ;;  %s1232_s11 = int_to_ptr.vmem [resolvable:$false] %s1231_s11 }
  0x8e   : > { %s1233_s12 = scalar_lea.vmem %s1232_s11, 32  ;;  %p1234_p5 = scmp.lt.s32.totalorder %s395_s20, %s1232_s11 }
  0x8f   : > { %p1229_p2 = pnand %p1227_p1, %p1503_p13  ;;  %p1235_p12 = scmp.lt.s32.totalorder %s1233_s12, %s1226_s26 }
  0x91   : > { %p1230_p3 = pneg %p1229_p2  ;;  %p1236_p4 = por %p1235_p12, %p1234_p5 }
  0x93   : > { %p1237_p0 = pnand %p1236_p4, %p1230_p3 }
  0x95   : > { %1240 = shalt.err (!%p1237_p0)
}
  0x96   : > { %1011 = dma.hbm_to_vmem [thread:$0]  (!%p1484_p7), %s392_s25, 16, %s395_s20, %s1497_s18  }
  0x97   : > { %p1718_p8 = scmp.ne.s32.totalorder %s1701_s21, 0 }
  0x98   : > { %s1578_s0 = sand.u32 (!%p1718_p8), 1, %s1309_s14   ;;  %p1719_p13 = scmp.ne.s32.totalorder (!%p1718_p8), %s1698_s19, 0 }
  0x99   : > { %410 = sbr.rel (%p1718_p8) target bundleno = 856 (0x358), region = 60  ;;  %s913_s24 = sshll.u32 (!%p1718_p8), %s1578_s0, 2 }
  0x9a   : > { %s413_s1 = scalar_lea.sflag (!%p1718_p8), [#allocation3], %s1578_s0  ;;  %s416_s22 = scalar_lea.vmem (!%p1718_p8), [#allocation2], %s913_s24 }
  0x9e   : > { %1284 = dma.done.wait (%p1719_p13), %s413_s1, 64  }
  0x9f   : > { %1286 = vsyncadd (%p1719_p13), %s413_s1, 4294967232  ;;  %s421_s21 = sand.u32 1, %s1407_s17   ;;  %s424_s30 = scalar_lea.vmem [#allocation5], %s1578_s0 }
  0xa0   : > { %s422_s18 = scalar_lea.sflag [#allocation6], %s421_s21 }
  0xa1   : > { %1288 = dma.done.wait (%p1719_p13), %s422_s18, 32  }
  0xa2   : > { %1290 = vsyncadd (%p1719_p13), %s422_s18, 4294967264  ;;  %s432_s29 = scalar_lea.vmem [#allocation7], %s1578_s0  ;;  %p1720_p7 = scmp.eq.s32.totalorder %s1407_s17, 0 }
  0xa4   : > { %1292 = dma.done.wait (%p1720_p7), [#allocation9], 272   ;;  %p1721_p11 = pmov %p1720_p7 }
  0xa5   : > { %p1722_p10 = pmov %p1720_p7 }
  0xa6   : > { %1294 = vsyncadd (%p1721_p11), [#allocation9], 4294967024 }
  0xa7   : > { %1296 = dma.done.wait (%p1722_p10), [#allocation12], 16   ;;  %p1723_p6 = pmov %p1720_p7 }
  0xa8   : > { %v1327_v0 = vmov 0.0   ;;  %vm1328_vm0 = vmmov 0   ;;  %v1065_v1 = vld [vmem:[%s1669_s4 + $0x8] sm:$0xff]   ;;  %v1066_v2 = vld [vmem:[%s1669_s4] sm:$0xff]   ;;  %vm522_vm1 = vcmask 261120   ;;  %v1067_v4 = vld [vmem:[#allocation10 + $0x8] sm:$0xff]  }
  0xa9   : > { %1298 = vsyncadd (%p1723_p6), [#allocation12], 4294967280  ;;  %948 = vmatprep.subr.bf16.mxu0 %v1327_v0  ;;  %952 = vmatprep.mubr.msk.bf16.mxu0 %vm1328_vm0, %v1327_v0  ;;  %v498_v3 = vld [vmem:[%s416_s22] sm:$0xf]  ;;  %v1068_v5 = vld [vmem:[#allocation10] sm:$0xff]   ;;  %p493_p9 = scmp.lt.s32.totalorder %s1407_s17, 1 }
  0xaa   : > { %956 = vmatprep.subr.bf16.mxu1 %v1327_v0  ;;  %960 = vmatprep.mubr.msk.bf16.mxu1 %vm1328_vm0, %v1327_v0  ;;  %v919_v6 = vld [vmem:[#allocation8] ss:$0 sm:$0xff]  ;;  %v923_v8 = vld [vmem:[%s424_s30] ss:$0 sm:$0xff]  ;;  %v1329_v19 = vmov 0   ;;  %s1724_s21 = sld [smem:[#allocation24_spill]] }
  0xab   : > { %949 = vmatpush3.bf16.msra.mxu0 %v1065_v1  ;;  %957 = vmatpush3.bf16.msra.mxu1 %v1067_v4  ;;  %v924_v10 = vld [vmem:[%s432_s29] ss:$0 sm:$0xff]  ;;  %v1069_v17 = vld [vmem:[%s1673_s8 + $0x8] sm:$0xff]   ;;  %s494_s5 = scalar_select %p493_p9, %s1407_s17, 1  ;;  %v925_v21 = vld [vmem:[#allocation11] ss:$0 sm:$0xff] }
  0xac   : > { %950 = vmatprep.subr.bf16.mxu0 %v1327_v0  ;;  %958 = vmatprep.subr.bf16.mxu1 %v1327_v0  ;;  %v1070_v18 = vld [vmem:[%s1673_s8] sm:$0xff]   ;;  %s936_s18 = sshll.u32 %s1407_s17, 6  ;;  %s492_s30 = scalar_lea.vmem [#allocation13], %s913_s24  ;;  %vm738_vm2 = vcmask 257024  }
  0xad   : > { %1064 = vset.pattern.permute.xlu0 %v1329_v19  ;;  %s918_s26 = sshll.u32 %s494_s5, 3  ;;  %v930_v33 = vld [vmem:[%s1674_s9] ss:$0 sm:$0xff]  ;;  %s754_s29 = sshll.u32 %s492_s30, 4  ;;  %s755_s29 = int_to_ptr.vmem [resolvable:$true] %s754_s29 }
  0xae   : > { %s496_s12 = scalar_lea.vmem %s1668_s3, %s918_s26  ;;  %s1725_s15 = sld [smem:[#allocation28_spill]] }
  0xaf   : > { %951 = vmatpush3.bf16.msra.mxu0 %v1066_v2  ;;  %959 = vmatpush3.bf16.msra.mxu1 %v1068_v5  ;;  %v730_v20 = vld [vmem:[%s496_s12] sm:$0xff]  ;;  %s741_s28 = scalar_lea.sflag [#allocation4], %s1578_s0  ;;  %s1241_s23 = scalar_lea.vmem %s755_s29, 64 }
  0xb0   : > { %964 = vmatprep.subr.bf16.mxu0 %v1327_v0  ;;  %733 = vperm.xlu0 %1064, %v730_v20   ;;  %p1242_p1 = scmp.ne.s32.totalorder %s755_s29, %s1241_s23  ;;  %p1727_p2 = scmp.ne.s32.totalorder %s1724_s21, 0 }
  0xb1   : > { %s1330_s10 = smov [#allocation13]  }
  0xb2   : > { %953 = vmatmul.mubr.msk.bf16.vlgmr.msra.gmra.mxu0 %vm522_vm1, %v498_v3  ;;  %p1243_p3 = pnand %p1242_p1, %p1727_p2  ;;  %s1245_s17 = sshll.u32 %s1330_s10, 4  ;;  %s1246_s17 = int_to_ptr.vmem [resolvable:$false] %s1245_s17 }
  0xb3   : > { %968 = vmatprep.mubr.msk.bf16.mxu0 %vm1328_vm0, %v1327_v0  ;;  %965 = vmatpush3.bf16.msra.mxu0 %v1069_v17  ;;  %s1247_s24 = scalar_lea.vmem %s1246_s17, 128  ;;  %p1248_p12 = scmp.lt.s32.totalorder %s755_s29, %s1246_s17 }
  0xb4   : > { %966 = vmatprep.subr.bf16.mxu0 %v1327_v0  ;;  %s1726_s20 = smov %s1725_s15  ;;  %s752_s27 = scalar_lea.hbm %s1725_s15, %s936_s18 }
  0xb5   : > { %p1244_p5 = pneg %p1243_p3  ;;  %p1249_p4 = scmp.lt.s32.totalorder %s1247_s24, %s1241_s23 }
  0xb7   : > { %967 = vmatpush3.bf16.msra.mxu0 %v1070_v18  ;;  %p1250_p0 = por %p1249_p4, %p1248_p12 }
  0xb9   : > { %p1251_p8 = pnand %p1250_p0, %p1244_p5 }
 0x12b   : > { %v734_v43 = vpop.permute.xlu0 %733 }
 0x172   : > { %v560_v7 = vpop.f32.mrf.mxu0 }
 0x173   : > { %v561_v9 = vadd.f32 %v919_v6, %v560_v7 }
 0x174   : > { %v954_v11 = vpop.f32.mrf.mxu0 }
 0x175   : > { %v573_v12 = vadd.f32 %v923_v8, %v561_v9 }
 0x176   : > { %v563_v13 = vpop.f32.mrf.mxu0 }
 0x177   : > { %v581_v14 = vadd.f32 %v924_v10, %v573_v12 }
 0x178   : > { %v955_v15 = vpop.f32.mrf.mxu0 }
 0x179   : > { %v582_v16 = vpack.c.bf16 %v581_v14, %v581_v14 }
 0x17b   : > { %961 = vmatmul.mubr.msk.bf16.vlgmr.msra.gmra.mxu1 %vm522_vm1, %v582_v16 }
 0x23b   : > { %v643_v22 = vpop.f32.mrf.mxu1 }
 0x23c   : > { %v644_v23 = vadd.f32 %v925_v21, %v643_v22 }
 0x23d   : > { %v962_v24 = vpop.f32.mrf.mxu1 }
 0x23e   : > { %v929_v25 = vmul.f32 -1.442695, %v644_v23 }
 0x23f   : > { %v646_v26 = vpop.f32.mrf.mxu1 }
 0x240   : > { %1071 = vpow2.f32 %v929_v25 }
 0x241   : > { %v963_v27 = vpop.f32.mrf.mxu1 }
 0x24d   : > { %v1072_v28 = vpop.eup %1071 }
 0x24e   : > { %v652_v29 = vadd.f32 1.0, %v1072_v28 }
 0x250   : > { %1073 = vrcp.f32 %v652_v29 }
 0x25d   : > { %v1074_v30 = vpop.eup %1073 }
 0x25e   : > { %v655_v31 = vmul.f32 %v1074_v30, %v644_v23 }
 0x260   : > { %v656_v32 = vpack.c.bf16 %v655_v31, %v655_v31 }
 0x262   : > { %969 = vmatmul.mubr.msk.bf16.vlgmr.msra.gmra.mxu0 %vm522_vm1, %v656_v32 }
 0x322   : > { %v717_v34 = vpop.f32.mrf.mxu0 }
 0x323   : > { %v718_v35 = vadd.f32 %v930_v33, %v717_v34 }
 0x324   : > { %v970_v36 = vpop.f32.mrf.mxu0 }
 0x325   : > { %v934_v37 = vmul.f32 -1.442695, %v718_v35 }
 0x326   : > { %v720_v38 = vpop.f32.mrf.mxu0 }
 0x327   : > { %1075 = vpow2.f32 %v934_v37 }
 0x328   : > { %v971_v39 = vpop.f32.mrf.mxu0 }
 0x334   : > { %v1076_v40 = vpop.eup %1075 }
 0x335   : > { %v726_v41 = vadd.f32 1.0, %v1076_v40 }
 0x337   : > { %1077 = vrcp.f32 %v726_v41 }
 0x344   : > { %v1078_v42 = vpop.eup %1077 }
 0x345   : > { %v729_v44 = vmul.f32 %v1078_v42, %v718_v35 }
 0x347   : > { %v736_v45 = vmul.f32 %v734_v43, %v729_v44 }
 0x349   : > { %v737_v46 = vpack.c.bf16 %v736_v45, %v736_v45 }
 0x34b   : > { %739 = vst.msk [vmem:[%s492_s30] sm:$0xf] %vm738_vm2, %v737_v46 }
 0x34c   : > { %1254 = shalt.err (!%p1251_p8)
}
 0x34d   : > { %s1255_s5 = scalar_lea.hbm %s752_s27, 64  ;;  %s1259_s13 = scalar_lea.hbm %s1726_s20, 128 }
 0x34e   : > { %p1256_p13 = scmp.ne.s32.totalorder %s752_s27, %s1255_s5  ;;  %p1260_p10 = scmp.lt.s32.totalorder %s752_s27, %s1726_s20 }
 0x34f   : > { %p1261_p6 = scmp.lt.s32.totalorder %s1259_s13, %s1255_s5 }
 0x350   : > { %p1257_p7 = pnand %p1256_p13, %p1727_p2 }
 0x351   : > { %p1262_p9 = por %p1261_p6, %p1260_p10 }
 0x352   : > { %p1258_p11 = pneg %p1257_p7 }
 0x354   : > { %p1263_p1 = pnand %p1262_p9, %p1258_p11 }
 0x356   : > { %1266 = shalt.err (!%p1263_p1)
}
 0x357   : > { %990 = dma.vmem_to_hbm [thread:$0]  (%p1727_p2), %s755_s29, 64, %s752_s27, %s741_s28  }
 0x358 PF: > { %s1728_s1 = sld [smem:[#allocation19_spill]]  ;;  %p1731_p5 = scmp.ge.s32.totalorder %s1317_s16, 2 }
 0x359   : > { %s1729_s22 = sld [smem:[#allocation21_spill]] }
 0x35e   : > { %s766_s18 = sand.u32 1, %s1728_s1  }
 0x35f   : > { %p1730_p3 = scmp.ne.s32.totalorder %s1729_s22, 0  ;;  %s767_s30 = scalar_lea.sflag [#allocation4], %s766_s18 }
 0x361   : > { %p1013_p12 = pnand %p1731_p5, %p1730_p3 }
 0x363   : > { %p1014_p4 = pneg %p1013_p12 }
 0x365   : > { %1300 = dma.done.wait (%p1014_p4), %s767_s30, 64  }
 0x366   : > { %1302 = vsyncadd (%p1014_p4), %s767_s30, 4294967232  ;;  %s1732_s16 = sld [smem:[#allocation22_spill]]  ;;  %s1735_s13 = smov %s1309_s14 }
 0x367   : > { %s1733_s19 = sld [smem:[#allocation20_spill]] }
 0x368   : > { %s1734_s15 = sld [smem:[#allocation23_spill]] }
 0x36c   : > { %p28_p0 = scmp.ge.s32.totalorder %s1732_s16, 4  }
 0x36d   : > { %s1736_s14 = smov %s1733_s19 }
 0x36e   :  { %30 = sbr.rel (!%p28_p0) target bundleno = 14 (0xe), region = 144 }
 0x373   :  { %772 = vsyncpa [#allocation3], 1 }
 0x374   :  { %774 = vsyncpa [#allocation3 + $0x1], 1 }
 0x375   :  { %775 = vsyncpa [#allocation6], 1 }
 0x376   :  { %777 = vsyncpa [#allocation6 + $0x1], 1 }
 0x377   :  { %778 = vsyncpa [#allocation9], 1 }
 0x378   :  { %779 = vsyncpa [#allocation12], 1 }
 0x379   :  { %780 = vsyncpa [#allocation4], 1 }
 0x37a   :  { %782 = vsyncpa [#allocation4 + $0x1], 1 }

</bundles_post_ra>
